<compile_context>
chip_gen: v7x
topology: tpu7x:2x2x1
jax: 0.10.0
libtpu: 0.0.40
codegen_flags: <defaults>
</compile_context>

<pallas_src>
import jax
import jax.numpy as jnp
from jax.experimental import pallas as pl
from jax.experimental.pallas import tpu as pltpu


def pooler_kernel(x_ref, w_ref, b_ref, o_ref):
    # x_ref : (TILE_B, Hp) f32   CLS activations (cast to bf16 per-tile, here)
    # w_ref : (Hp, Hp)     bf16  pre-transposed (in, out) weight, VMEM-resident
    # b_ref : (1, Hp)      f32   bias
    # o_ref : (TILE_B, Hp) f32
    x = x_ref[...].astype(jnp.bfloat16)
    y = jnp.dot(x, w_ref[...], preferred_element_type=jnp.float32)   # MXU, f32 acc
    # bias add (VPU) + tanh (EUP) stay in f32 — correct on v5e and free under the MXU.
    o_ref[...] = jnp.tanh(y + b_ref[...]).astype(o_ref.dtype)


def _round_up(x, m):
    return (x + m - 1) // m * m


def _pick_tile_b(batch, cap):
    """Batch tile: sublane-aligned, <= cap, and >= 2 grid steps when possible
    (a single-step grid leaves one v7x TensorCore idle and gives the BlockSpec
    pipeline nothing to prefetch on v5e/v6e)."""
    if batch <= 8:
        return 8
    half = _round_up((batch + 1) // 2, 8)
    return max(8, min(cap, half))


def bert_output_pool(inputs, w_pool, b_pool, *, tile_b=128):
    """inputs: (B, S, H); w_pool: (H, H) torch-style (out, in); b_pool: (H,)."""
    B, S, H = inputs.shape

    # Alignment (no-ops at real BERT shapes: H multiple of 128).
    Hp = _round_up(H, 128)
    TILE_B = _pick_tile_b(B, tile_b)
    Bp = _round_up(B, TILE_B)

    x = inputs
    # One-time weight prep (wrapper, not per-step): transpose to (in, out) so
    # the kernel contraction is canonical, then cast to bf16 for the MXU.
    w = w_pool.T
    b = b_pool
    if Hp != H:
        x = jnp.pad(x, ((0, 0), (0, 0), (0, Hp - H)))
        w = jnp.pad(w, ((0, Hp - H), (0, Hp - H)))
        b = jnp.pad(b, (0, Hp - H))
    if Bp != B:
        x = jnp.pad(x, ((0, Bp - B), (0, 0), (0, 0)))
    w = w.astype(jnp.bfloat16)                       # halves weight HBM/VMEM
    b2 = b.astype(jnp.float32).reshape(1, Hp)

    # Free reshape: row b = [tok0_hidden, tok1_hidden, ...]; cols [0:Hp) = CLS.
    x_flat = x.reshape(Bp, S * Hp)

    grid = (Bp // TILE_B,)

    xbytes = x_flat.dtype.itemsize
    obytes = jnp.dtype(inputs.dtype).itemsize
    vmem_bytes = (
        2 * Hp * Hp * 2                  # double-buffered resident bf16 weight
        + 2 * Hp * 4                     # bias
        + 2 * TILE_B * Hp * xbytes       # double-buffered input tiles
        + 2 * TILE_B * Hp * obytes       # double-buffered output tiles
        + (4 << 20)                      # slack for compiler temporaries
    )
    # TODO(synk): pipeline_mode=pl.Buffered(1) on the weight/bias specs would
    # also drop their second (never re-DMA'd) buffer once that path is vetted.

    out = pl.pallas_call(
        pooler_kernel,
        out_shape=jax.ShapeDtypeStruct((Bp, Hp), inputs.dtype),
        grid=grid,
        in_specs=[
            # CLS gather fused into the tile DMA (block (i, 0) of the flat view).
            pl.BlockSpec((TILE_B, Hp), lambda i: (i, 0)),
            # Weight resident in VMEM across all batch tiles (constant index).
            pl.BlockSpec((Hp, Hp), lambda i: (0, 0)),
            pl.BlockSpec((1, Hp), lambda i: (0, 0)),
        ],
        out_specs=pl.BlockSpec((TILE_B, Hp), lambda i: (i, 0)),
        compiler_params=pltpu.CompilerParams(
            dimension_semantics=("parallel",),       # shard batch tiles across TCs
            vmem_limit_bytes=int(vmem_bytes),
        ),
        cost_estimate=pl.CostEstimate(
            flops=2 * Bp * Hp * Hp,
            transcendentals=Bp * Hp,
            bytes_accessed=(Bp * Hp * xbytes         # CLS rows read
                            + Hp * Hp * 2            # bf16 weight
                            + Hp * 4                 # bias
                            + Bp * Hp * obytes),     # output
        ),
    )(x_flat, w, b2)

    # No-op slices when no padding was applied.
    return out[:B, :H]


def reference(inputs, w_pool, b_pool):
    x = inputs[:, 0]
    return jnp.tanh(x @ w_pool.T + b_pool)


def _make_case(key, B, S, H):
    k_in, k_w, k_b = jax.random.split(key, 3)
    inputs = jax.random.normal(k_in, (B, S, H), dtype=jnp.float32)
    # truncated_normal_(mean=0, stddev=0.02) equivalent for pooler_dense.weight
    # (torch-style (out_features, in_features)); small deterministic bias.
    w_pool = 0.02 * jax.random.truncated_normal(k_w, -2.0, 2.0, (H, H), dtype=jnp.float32)
    b_pool = 0.02 * jax.random.normal(k_b, (H,), dtype=jnp.float32)
    return inputs, w_pool, b_pool


if __name__ == "__main__":
    key = jax.random.PRNGKey(0)
    k1, k2 = jax.random.split(key)

    # Case 1: module-sized small shapes (grid = 1, padded H -> 128).
    inputs, w_pool, b_pool = _make_case(k1, B=2, S=8, H=32)
    out = jax.block_until_ready(bert_output_pool(inputs, w_pool, b_pool))
    ref = reference(inputs, w_pool, b_pool)
    assert out.shape == (2, 32)
    # bf16 matmul (f32 accumulate) -> loosened tolerance vs the f32 reference.
    assert jnp.allclose(out, ref, atol=1e-2, rtol=1e-2), float(jnp.max(jnp.abs(out - ref)))

    # Case 2: multi-step grid (>=2 tiles): resident-weight reuse + real CLS-gather stride.
    inputs, w_pool, b_pool = _make_case(k2, B=24, S=8, H=128)
    out = jax.block_until_ready(bert_output_pool(inputs, w_pool, b_pool))
    ref = reference(inputs, w_pool, b_pool)
    assert out.shape == (24, 128)
    assert jnp.allclose(out, ref, atol=1e-2, rtol=1e-2), float(jnp.max(jnp.abs(out - ref)))

    # TODO(synk): with_mlm / with_nsp branches not exercised by the default config
    # (with_mlm path is also buggy in the source: `self.mlm_norm(x)(x)`).
    print("KERNEL_OK")
</pallas_src>

<mosaic_0001>
module attributes {stable_mosaic.version = 11 : i64} {
  func.func @pooler_kernel(%arg0: i32, %arg1: memref<8x128xf32, #tpu.memory_space<vmem>>, %arg2: memref<128x128xbf16, #tpu.memory_space<vmem>>, %arg3: memref<1x128xf32, #tpu.memory_space<vmem>>, %arg4: memref<8x128xf32, #tpu.memory_space<vmem>>) attributes {dimension_semantics = [#tpu.dimension_semantics<parallel>], iteration_bounds = array<i64: 1>, scalar_prefetch = 0 : i64, scratch_operands = 0 : i64, tpu.core_type = #tpu.core_type<tc>, window_params = [{transform_indices = @transform_0, window_bounds = array<i64: 8, 128>}, {pipeline_mode = #tpu.pipeline_mode<synchronous>, transform_indices = @transform_1, window_bounds = array<i64: 128, 128>}, {pipeline_mode = #tpu.pipeline_mode<synchronous>, transform_indices = @transform_2, window_bounds = array<i64: 1, 128>}, {transform_indices = @transform_3, window_bounds = array<i64: 8, 128>}]} {
    %c0 = arith.constant 0 : index
    %c0_0 = arith.constant 0 : index
    %0 = vector.load %arg1[%c0, %c0_0] : memref<8x128xf32, #tpu.memory_space<vmem>>, vector<8x128xf32>
    %1 = arith.truncf %0 : vector<8x128xf32> to vector<8x128xbf16>
    %c0_1 = arith.constant 0 : index
    %c0_2 = arith.constant 0 : index
    %2 = vector.load %arg2[%c0_1, %c0_2] : memref<128x128xbf16, #tpu.memory_space<vmem>>, vector<128x128xbf16>
    %cst = arith.constant dense<0.000000e+00> : vector<8x128xf32>
    %3 = tpu.matmul %1, %2, %cst {dimension_numbers = #tpu.dot_dimension_numbers<[1], [0], [0], [1], [0, 0, 1, 1], [], []>} : vector<8x128xbf16>, vector<128x128xbf16>, vector<8x128xf32> -> vector<8x128xf32>
    %c0_3 = arith.constant 0 : index
    %c0_4 = arith.constant 0 : index
    %4 = vector.load %arg3[%c0_3, %c0_4] : memref<1x128xf32, #tpu.memory_space<vmem>>, vector<1x128xf32>
    %5 = vector.broadcast %4 : vector<1x128xf32> to vector<8x128xf32>
    %6 = arith.addf %3, %5 : vector<8x128xf32>
    %7 = math.tanh %6 : vector<8x128xf32>
    %c0_5 = arith.constant 0 : index
    %c0_6 = arith.constant 0 : index
    %8 = vector.load %arg4[%c0_5, %c0_6] : memref<8x128xf32, #tpu.memory_space<vmem>>, vector<8x128xf32>
    tpu.vector_store %arg4[%c0_5, %c0_6], %7 {strides = array<i32>} : memref<8x128xf32, #tpu.memory_space<vmem>>, vector<8x128xf32>,
    return
  }
  func.func @transform_0(%arg0: i32) -> (i32, i32) {
    %c0_i32 = arith.constant 0 : i32
    %c0_i32_0 = arith.constant 0 : i32
    return %arg0, %c0_i32 : i32, i32
  }
  func.func @transform_1(%arg0: i32) -> (i32, i32) {
    %c0_i32 = arith.constant 0 : i32
    %c0_i32_0 = arith.constant 0 : i32
    %c0_i32_1 = arith.constant 0 : i32
    return %c0_i32, %c0_i32_0 : i32, i32
  }
  func.func @transform_2(%arg0: i32) -> (i32, i32) {
    %c0_i32 = arith.constant 0 : i32
    %c0_i32_0 = arith.constant 0 : i32
    %c0_i32_1 = arith.constant 0 : i32
    return %c0_i32, %c0_i32_0 : i32, i32
  }
  func.func @transform_3(%arg0: i32) -> (i32, i32) {
    %c0_i32 = arith.constant 0 : i32
    %c0_i32_0 = arith.constant 0 : i32
    return %arg0, %c0_i32 : i32, i32
  }
}

</mosaic_0001>

<bundles_post_ra>
// kernel: tpu_custom_call.1
= control target key start
LH: loop header
LB: loop body
LE: loop exit
PB: predicated region body
PF: predicated region fallthrough
CT: control target
= control target key end

     0   :  { %8 = vsyncpa [#allocation3], 0  ;;  %s376_s0 = inlined_call_operand.hbm [shape: f32[8,1024], index: 0, kind: input, shape index: {}]   ;;  %s377_s1 = inlined_call_operand.hbm [shape: bf16[128,128], index: 1, kind: input, shape index: {}]   ;;  %s378_s2 = inlined_call_operand.vmem [shape: f32[1,128], index: 2, kind: input, shape index: {}]   ;;  %s379_s3 = inlined_call_operand.hbm [shape: f32[8,128], index: 3, kind: output, shape index: {}]  }
   0x1   :  { %9 = vsyncpa [#allocation6], 0 }
   0x2   :  { %10 = vsyncpa [#allocation4], 0  ;;  %s300_s12 = smov [#allocation2]   ;;  %s301_s14 = smov [#allocation5]  }
   0x3   :  { %s17_s13 = sshll.u32 %s300_s12, 4  ;;  %s26_s15 = sshll.u32 %s301_s14, 4  ;;  %s18_s13 = int_to_ptr.vmem [resolvable:$true] %s17_s13  ;;  %s327_s15 = int_to_ptr.vmem [resolvable:$true] %s26_s15 }
   0x4   :  { %s228_s18 = scalar_lea.hbm %s376_s0, 128  ;;  %s230_s23 = scalar_lea.hbm %s376_s0, 1024 }
   0x5   :  { %p229_p0 = scmp.ne.s32.totalorder %s376_s0, %s228_s18  ;;  %p231_p1 = scmp.lt.u32.totalorder %s230_s23, %s228_s18 }
   0x6   :  { %p232_p2 = scmp.lt.u32.totalorder %s228_s18, %s376_s0 }
   0x8   :  { %p233_p3 = por %p232_p2, %p231_p1 }
   0xa   :  { %p234_p4 = pnand %p233_p3, %p229_p0 }
   0xc   :  { %237 = shalt.err (!%p234_p4)
}
   0xd   :  { %s238_s26 = scalar_lea.vmem %s18_s13, 128  ;;  %p243_p6 = scmp.lt.s32.totalorder %s18_s13, %s18_s13 }
   0xe   :  { %p239_p5 = scmp.ne.s32.totalorder %s18_s13, %s238_s26  ;;  %p244_p7 = scmp.lt.s32.totalorder %s238_s26, %s238_s26 }
  0x10   :  { %p245_p8 = por %p244_p7, %p243_p6 }
  0x12   :  { %p246_p9 = pnand %p245_p8, %p239_p5 }
  0x14   :  { %249 = shalt.err (!%p246_p9)
}
  0x15   :  { %20 = dma.hbm_to_vmem [thread:$0]  %s376_s0, 128, %s18_s13, [#allocation3]  }
  0x16   :  { %s250_s4 = scalar_lea.hbm %s377_s1, 1024 }
  0x17   :  { %p251_p10 = scmp.ne.s32.totalorder %s377_s1, %s250_s4  ;;  %p254_p11 = scmp.lt.u32.totalorder %s250_s4, %s377_s1 }
  0x19   :  { %p256_p12 = pnand %p254_p11, %p251_p10 }
  0x1b   :  { %259 = shalt.err (!%p256_p12)
}
  0x1c   :  { %s260_s9 = scalar_lea.vmem %s327_s15, 1024  ;;  %p265_p0 = scmp.lt.s32.totalorder %s327_s15, %s327_s15 }
  0x1d   :  { %p261_p13 = scmp.ne.s32.totalorder %s327_s15, %s260_s9  ;;  %p266_p1 = scmp.lt.s32.totalorder %s260_s9, %s260_s9 }
  0x1f   :  { %p267_p2 = por %p266_p1, %p265_p0 }
  0x21   :  { %p268_p3 = pnand %p267_p2, %p261_p13 }
  0x23   :  { %271 = shalt.err (!%p268_p3)
}
  0x24   :  { %s302_s0 = smov 64   ;;  %s303_s10 = smov 4  }
  0x25   :  { %32 = dma.hbm_to_vmem [thread:$0]  %s377_s1, 1024, %s327_s15, [#allocation6], %s302_s0, %s302_s0, %s303_s10  }
  0x26   :  { %294 = dma.done.wait [#allocation3], 128  }
  0x27   :  { %295 = vsyncadd [#allocation3], 4294967168 }
  0x28   :  { %296 = dma.done.wait [#allocation6], 1024  }
  0x29   :  { %297 = vsyncadd [#allocation6], 4294966272  ;;  %v304_v0 = vmov 0.0   ;;  %vm305_vm0 = vmmov 0   ;;  %v218_v1 = vld [vmem:[#allocation5] sm:$0xff]   ;;  %v219_v2 = vld [vmem:[#allocation5 + $0x8] sm:$0xff]  }
  0x2a   :  { %191 = vmatprep.subr.bf16.mxu0 %v304_v0  ;;  %207 = vmatprep.mubr.msk.bf16.mxu0 %vm305_vm0, %v304_v0  ;;  %v220_v3 = vld [vmem:[#allocation5 + $0x10] sm:$0xff]   ;;  %v221_v4 = vld [vmem:[#allocation5 + $0x18] sm:$0xff]   ;;  %v222_v5 = vld [vmem:[#allocation5 + $0x20] sm:$0xff]   ;;  %s306_s14 = smov [#allocation7]  }
  0x2b   :  { %192 = vmatpush3.bf16.msra.mxu0 %v218_v1  ;;  %v223_v6 = vld [vmem:[#allocation5 + $0x28] sm:$0xff]   ;;  %v224_v7 = vld [vmem:[#allocation5 + $0x30] sm:$0xff]   ;;  %v225_v8 = vld [vmem:[#allocation5 + $0x38] sm:$0xff]   ;;  %s163_s15 = sshll.u32 %s306_s14, 4  ;;  %s164_s15 = int_to_ptr.vmem [resolvable:$true] %s163_s15 }
  0x2c   :  { %193 = vmatprep.subr.bf16.mxu0 %v304_v0  ;;  %v42_v9 = vld [vmem:[#allocation2] sm:$0xff]  ;;  %s272_s16 = scalar_lea.vmem %s164_s15, 128  ;;  %p277_p5 = scmp.lt.s32.totalorder %s164_s15, %s164_s15 }
  0x2d   :  { %v43_v10 = vpack.c.bf16 %v42_v9, %v42_v9  ;;  %v173_v11 = vld [vmem:[%s378_s2] ss:$0 sm:$0xff]  ;;  %p273_p4 = scmp.ne.s32.totalorder %s164_s15, %s272_s16  ;;  %p278_p6 = scmp.lt.s32.totalorder %s272_s16, %s272_s16 }
  0x2f   :  { %194 = vmatpush3.bf16.msra.mxu0 %v219_v2  ;;  %p279_p7 = por %p278_p6, %p277_p5 }
  0x30   :  { %195 = vmatprep.subr.bf16.mxu0 %v304_v0 }
  0x31   :  { %p280_p8 = pnand %p279_p7, %p273_p4 }
  0x33   :  { %196 = vmatpush3.bf16.msra.mxu0 %v220_v3 }
  0x34   :  { %197 = vmatprep.subr.bf16.mxu0 %v304_v0 }
  0x37   :  { %198 = vmatpush3.bf16.msra.mxu0 %v221_v4 }
  0x38   :  { %199 = vmatprep.subr.bf16.mxu0 %v304_v0 }
  0x3b   :  { %200 = vmatpush3.bf16.msra.mxu0 %v222_v5 }
  0x3c   :  { %201 = vmatprep.subr.bf16.mxu0 %v304_v0 }
  0x3f   :  { %202 = vmatpush3.bf16.msra.mxu0 %v223_v6 }
  0x40   :  { %203 = vmatprep.subr.bf16.mxu0 %v304_v0 }
  0x43   :  { %204 = vmatpush3.bf16.msra.mxu0 %v224_v7 }
  0x44   :  { %205 = vmatprep.subr.bf16.mxu0 %v304_v0 }
  0x47   :  { %206 = vmatpush3.bf16.msra.mxu0 %v225_v8 }
  0x4a   :  { %208 = vmatmul.mubr.bf16.vlgmr.msra.gmra.mrb[0].mxu0 %v43_v10 }
 0x11d   :  { %v149_v12 = vpop.f32.mrb[0].mxu0 }
 0x11e   :  { %v150_v13 = vadd.f32 %v173_v11, %v149_v12  ;;  %v209_v14 = vpop.f32.mrb[1].mxu0 }
 0x11f   :  { %v152_v15 = vpop.f32.mrb[2].mxu0 }
 0x120   :  { %226 = vtanh.f32 %v150_v13  ;;  %v210_v16 = vpop.f32.mrb[3].mxu0 }
 0x12a   :  { %v227_v17 = vpop.eup %226 }
 0x12b   :  { %156 = vst [vmem:[#allocation7] sm:$0xff] %v227_v17 }
 0x12c   :  { %283 = shalt.err (!%p280_p8)
}
 0x12d   :  { %s284_s18 = scalar_lea.hbm %s379_s3, 128 }
 0x12e   :  { %p285_p9 = scmp.ne.s32.totalorder %s379_s3, %s284_s18  ;;  %p288_p10 = scmp.lt.u32.totalorder %s284_s18, %s379_s3 }
 0x130   :  { %p290_p11 = pnand %p288_p10, %p285_p9 }
 0x132   :  { %293 = shalt.err (!%p290_p11)
}
 0x133   :  { %166 = dma.vmem_to_hbm [thread:$0]  %s164_s15, 128, %s379_s3, [#allocation4]  }
 0x134   :  { %298 = dma.done.wait [#allocation4], 128  }
 0x135   :  { %299 = vsyncadd [#allocation4], 4294967168 }
 0x136   :  { %170 = vsyncpa [#allocation3], 1 }
 0x137   :  { %171 = vsyncpa [#allocation6], 1 }
 0x138   :  { %172 = vsyncpa [#allocation4], 1 }

</bundles_post_ra>
